<compile_context>
chip_gen: v5e
topology: v5e:2x2
jax: 0.10.0
libtpu: 0.0.40
codegen_flags: <defaults>
</compile_context>

<pallas_src>
import functools
import math

import jax
import jax.numpy as jnp
from jax.experimental import pallas as pl
from jax.experimental.pallas import tpu as pltpu


def _round_up(a, b):
    return (a + b - 1) // b * b


def _label_smoothing_kernel(tgt_ref, x_ref, loss_ref, *maybe_td_ref,
                            confidence, low, c_conf, c_low, padding_idx,
                            v_actual, col_axis, ragged_v, compute_dtype,
                            emit_true_dist):
    tm, tv = x_ref.shape
    col_off = pl.program_id(col_axis) * tv          # global column of lane 0

    x = x_ref[...]
    if x.dtype != compute_dtype:
        x = x.astype(compute_dtype)
    tgt = tgt_ref[...]                              # (tm, 1) int32 targets

    # Tile-local column index; comparands carry the scalar global offset so no
    # full-tile iota+add is needed.
    col = jax.lax.broadcasted_iota(jnp.int32, (tm, tv), 1)
    is_tgt = col == (tgt - col_off)
    dead = (col == (padding_idx - col_off)) | (tgt == padding_idx)
    if ragged_v:                                    # only when V % tv != 0
        dead = dead | (col >= (v_actual - col_off))

    # Pointwise KL term: t*(log t - x) == C - t*x with C = t*log t folded at
    # trace time; zero-valued branches are literal zeros (never touch x).
    tgt_branch = (c_conf - confidence * x) if confidence > 0.0 else 0.0
    low_branch = (c_low - low * x) if low > 0.0 else 0.0
    pw = jnp.where(is_tgt, tgt_branch, low_branch)
    pw = jnp.where(dead, 0.0, pw)

    # Fold the (tm, tv) tile into one (8, 128) f32 vreg with aligned sub-block
    # adds (VALU only); the cross-tile / cross-vreg sum happens outside.
    acc = pw[:, 0:128].astype(jnp.float32)
    for c in range(1, tv // 128):
        acc = acc + pw[:, c * 128:(c + 1) * 128].astype(jnp.float32)
    out = acc[0:8, :]
    for r in range(1, tm // 8):
        out = out + acc[r * 8:(r + 1) * 8, :]
    loss_ref[...] = out

    if emit_true_dist:
        td_ref = maybe_td_ref[0]
        td = jnp.where(is_tgt, jnp.float32(confidence), jnp.float32(low))
        td = jnp.where(dead, jnp.float32(0.0), td)
        td_ref[...] = td.astype(td_ref.dtype)


def label_smoothing_loss(x, target, *, size, padding_idx, smoothing=0.0,
                         emit_true_dist=True, block_rows=256, block_cols=1024,
                         compute_in_bf16=None):
    """Forward pass of LabelSmoothing.

    Returns (loss, true_dist) if emit_true_dist else loss.
    Layout: V (class axis, PyTorch dim=1) maps to TPU lanes, N to sublanes.
    """
    n, v = x.shape
    assert v == size
    assert v != 2, "smoothing / (size - 2) divides by zero when size == 2"
    confidence = 1.0 - smoothing
    low = smoothing / (v - 2)
    c_conf = confidence * math.log(confidence) if confidence > 0.0 else 0.0
    c_low = low * math.log(low) if low > 0.0 else 0.0

    # (8,128)-aligned, lane-dense tiles; grid covers the arrays with cdiv so
    # edge blocks may overhang (x is NOT padded).
    tm = _round_up(min(block_rows, n), 8)
    tv = _round_up(min(block_cols, v), 128)
    gm = pl.cdiv(n, tm)
    gv = pl.cdiv(v, tv)
    ragged_v = (v % tv) != 0

    # Only target is padded (1-D, cheap); padded rows carry padding_idx so the
    # kernel needs no row-bound mask.
    tgt = target.astype(jnp.int32)
    if gm * tm != n:
        tgt = jnp.pad(tgt, (0, gm * tm - n), constant_values=padding_idx)
    tgt = tgt.reshape(gm * tm, 1)

    # bf16 VALU compute only where the hardware has it (v6e / v7x).
    if compute_in_bf16 is None:
        kind = ""
        try:
            kind = jax.devices()[0].device_kind.lower()
        except Exception:
            pass
        compute_in_bf16 = bool(kind) and ("v4" not in kind) and ("v5" not in kind)
    use_bf16 = bool(compute_in_bf16) and x.dtype == jnp.bfloat16
    compute_dtype = jnp.bfloat16 if use_bf16 else jnp.float32

    # Megacore / v7x: lead with the grid axis that has more blocks so the
    # sharded "parallel" axis never has a single block while the other is wide.
    if gm >= gv:
        row_axis, col_axis = 0, 1
        grid = (gm, gv)
    else:
        row_axis, col_axis = 1, 0
        grid = (gv, gm)

    tgt_spec = pl.BlockSpec((tm, 1), lambda *g: (g[row_axis], 0))
    x_spec = pl.BlockSpec((tm, tv), lambda *g: (g[row_axis], g[col_axis]))
    loss_spec = pl.BlockSpec((8, 128), lambda *g: (g[row_axis], g[col_axis]))
    td_spec = pl.BlockSpec((tm, tv), lambda *g: (g[row_axis], g[col_axis]))

    out_shapes = [jax.ShapeDtypeStruct((gm * 8, gv * 128), jnp.float32)]
    out_specs = [loss_spec]
    if emit_true_dist:
        # Exact (N, V): overhanging edge blocks use masked partial stores, so
        # no post-kernel slice (and no extra HBM round trip) is needed.
        out_shapes.append(jax.ShapeDtypeStruct((n, v), x.dtype))
        out_specs.append(td_spec)

    # VMEM budget: double-buffered x (+ td) tiles, elementwise temporaries in
    # the compute dtype, loss blocks, slack; clamped to physical VMEM.
    in_item = jnp.dtype(x.dtype).itemsize
    cd_item = jnp.dtype(compute_dtype).itemsize
    tile = tm * tv
    want = 2 * tile * in_item
    if emit_true_dist:
        want += 2 * tile * in_item
    want += 4 * tile * cd_item + 2 * 8 * 128 * 4 + (2 << 20)
    try:
        cap = int(pltpu.get_tpu_info().vmem_capacity_bytes)
    except Exception:
        cap = 64 * 1024 * 1024              # conservative (v7x per-TC physical)
    vmem_limit = int(min(max(want, 16 * 1024 * 1024), (cap * 3) // 4))

    kernel = functools.partial(
        _label_smoothing_kernel,
        confidence=float(confidence), low=float(low),
        c_conf=float(c_conf), c_low=float(c_low),
        padding_idx=int(padding_idx), v_actual=int(v),
        col_axis=col_axis, ragged_v=bool(ragged_v),
        compute_dtype=compute_dtype, emit_true_dist=bool(emit_true_dist))

    outs = pl.pallas_call(
        kernel,
        out_shape=tuple(out_shapes),
        grid_spec=pltpu.PrefetchScalarGridSpec(
            num_scalar_prefetch=0,
            grid=grid,
            in_specs=[tgt_spec, x_spec],
            out_specs=tuple(out_specs)),
        compiler_params=pltpu.CompilerParams(
            dimension_semantics=("parallel", "parallel"),
            vmem_limit_bytes=vmem_limit),
    )(tgt, x)

    loss = jnp.sum(outs[0])
    if emit_true_dist:
        return loss, outs[1]
    return loss


def _reference(x, target, *, padding_idx, smoothing):
    n, v = x.shape
    confidence = 1.0 - smoothing
    col = jnp.arange(v)[None, :]
    td = jnp.full((n, v), smoothing / (v - 2), jnp.float32)
    td = jnp.where(col == target[:, None], confidence, td)
    td = jnp.where(col == padding_idx, 0.0, td)
    td = jnp.where(target[:, None] == padding_idx, 0.0, td)
    pw = jnp.where(td > 0, td * (jnp.log(td) - x.astype(jnp.float32)), 0.0)
    return jnp.sum(pw), td


if __name__ == "__main__":
    key = jax.random.PRNGKey(0)
    N, V = 13, 200                     # small, deliberately not (8,128)-aligned
    padding_idx = 0
    smoothing = 0.1

    kx, kt = jax.random.split(key)
    logits = jax.random.normal(kx, (N, V), dtype=jnp.float32)
    x = jax.nn.log_softmax(logits, axis=-1)             # KLDivLoss expects log-probs
    target = jax.random.randint(kt, (N,), 0, V, dtype=jnp.int32)
    target = target.at[-1].set(padding_idx)             # exercise the padding-row path

    ref_loss, ref_td = _reference(x, target, padding_idx=padding_idx, smoothing=smoothing)

    # Small tiles -> 2x2 grid with overhanging edge blocks on both axes.
    loss, true_dist = label_smoothing_loss(
        x, target, size=V, padding_idx=padding_idx, smoothing=smoothing,
        emit_true_dist=True, block_rows=8, block_cols=128)
    jax.block_until_ready((loss, true_dist))
    assert jnp.allclose(loss, ref_loss, rtol=1e-5, atol=1e-5)
    assert jnp.allclose(true_dist, ref_td, rtol=1e-6, atol=1e-6)

    # Loss-only path (no (N,V) true_dist writeback); gm < gv exercises the
    # swapped (column-leading) grid ordering.
    loss_only = label_smoothing_loss(
        x, target, size=V, padding_idx=padding_idx, smoothing=smoothing,
        emit_true_dist=False, block_rows=16, block_cols=128)
    jax.block_until_ready(loss_only)
    assert jnp.allclose(loss_only, ref_loss, rtol=1e-5, atol=1e-5)

    # Default (large) tile config: single tile overhanging both dims.
    loss_big = label_smoothing_loss(
        x, target, size=V, padding_idx=padding_idx, smoothing=smoothing,
        emit_true_dist=False)
    jax.block_until_ready(loss_big)
    assert jnp.allclose(loss_big, ref_loss, rtol=1e-5, atol=1e-5)

    # smoothing == 0 edge case: the zero-valued branch never multiplies x.
    ref0, _ = _reference(x, target, padding_idx=padding_idx, smoothing=0.0)
    loss0 = label_smoothing_loss(
        x, target, size=V, padding_idx=padding_idx, smoothing=0.0,
        emit_true_dist=False, block_rows=8, block_cols=128)
    jax.block_until_ready(loss0)
    assert jnp.allclose(loss0, ref0, rtol=1e-5, atol=1e-5)

    print("KERNEL_OK")
</pallas_src>

<mosaic_0001>
module attributes {stable_mosaic.version = 11 : i64} {
  func.func @_label_smoothing_kernel(%arg0: i32, %arg1: i32, %arg2: memref<8x1xi32, #tpu.memory_space<vmem>>, %arg3: memref<8x128xf32, #tpu.memory_space<vmem>>, %arg4: memref<8x128xf32, #tpu.memory_space<vmem>>, %arg5: memref<8x128xf32, #tpu.memory_space<vmem>>) attributes {dimension_semantics = [#tpu.dimension_semantics<parallel>, #tpu.dimension_semantics<parallel>], iteration_bounds = array<i64: 2, 2>, scalar_prefetch = 0 : i64, scratch_operands = 0 : i64, tpu.core_type = #tpu.core_type<tc>, window_params = [{transform_indices = @transform_0, window_bounds = array<i64: 8, 1>}, {transform_indices = @transform_1, window_bounds = array<i64: 8, 128>}, {transform_indices = @transform_2, window_bounds = array<i64: 8, 128>}, {transform_indices = @transform_3, window_bounds = array<i64: 8, 128>}]} {
    %c128_i32 = arith.constant 128 : i32
    %0 = arith.muli %arg1, %c128_i32 : i32
    %c0 = arith.constant 0 : index
    %c0_0 = arith.constant 0 : index
    %1 = vector.load %arg3[%c0, %c0_0] : memref<8x128xf32, #tpu.memory_space<vmem>>, vector<8x128xf32>
    %c0_1 = arith.constant 0 : index
    %c0_2 = arith.constant 0 : index
    %2 = vector.load %arg2[%c0_1, %c0_2] : memref<8x1xi32, #tpu.memory_space<vmem>>, vector<8x1xi32>
    %3 = tpu.iota {dimensions = array<i32: 1>} : vector<8x128xi32>
    %4 = vector.broadcast %0 : i32 to vector<8x1xi32>
    %5 = arith.subi %2, %4 : vector<8x1xi32>
    %6 = vector.broadcast %5 : vector<8x1xi32> to vector<8x128xi32>
    %7 = arith.cmpi eq, %3, %6 : vector<8x128xi32>
    %c0_i32 = arith.constant 0 : i32
    %8 = arith.subi %c0_i32, %0 : i32
    %9 = vector.broadcast %8 : i32 to vector<8x128xi32>
    %10 = arith.cmpi eq, %3, %9 : vector<8x128xi32>
    %c0_i32_3 = arith.constant 0 : i32
    %11 = vector.broadcast %c0_i32_3 : i32 to vector<8x1xi32>
    %12 = arith.cmpi eq, %2, %11 : vector<8x1xi32>
    %13 = vector.broadcast %12 : vector<8x1xi1> to vector<8x128xi1>
    %14 = arith.ori %10, %13 : vector<8x128xi1>
    %c200_i32 = arith.constant 200 : i32
    %15 = arith.subi %c200_i32, %0 : i32
    %16 = vector.broadcast %15 : i32 to vector<8x128xi32>
    %17 = arith.cmpi sge, %3, %16 : vector<8x128xi32>
    %18 = arith.ori %14, %17 : vector<8x128xi1>
    %cst = arith.constant 0.899999976 : f32
    %19 = vector.broadcast %cst : f32 to vector<8x128xf32>
    %20 = arith.mulf %19, %1 : vector<8x128xf32>
    %cst_4 = arith.constant -0.0948244631 : f32
    %21 = vector.broadcast %cst_4 : f32 to vector<8x128xf32>
    %22 = arith.subf %21, %20 : vector<8x128xf32>
    %cst_5 = arith.constant 5.05050528E-4 : f32
    %23 = vector.broadcast %cst_5 : f32 to vector<8x128xf32>
    %24 = arith.mulf %23, %1 : vector<8x128xf32>
    %cst_6 = arith.constant -0.00383376377 : f32
    %25 = vector.broadcast %cst_6 : f32 to vector<8x128xf32>
    %26 = arith.subf %25, %24 : vector<8x128xf32>
    %27 = arith.select %7, %22, %26 : vector<8x128xi1>, vector<8x128xf32>
    %cst_7 = arith.constant 0.000000e+00 : f32
    %28 = vector.broadcast %cst_7 : f32 to vector<8x128xf32>
    %29 = arith.select %18, %28, %27 : vector<8x128xi1>, vector<8x128xf32>
    %c0_8 = arith.constant 0 : index
    %c0_9 = arith.constant 0 : index
    %30 = vector.load %arg4[%c0_8, %c0_9] : memref<8x128xf32, #tpu.memory_space<vmem>>, vector<8x128xf32>
    tpu.vector_store %arg4[%c0_8, %c0_9], %29 {strides = array<i32>} : memref<8x128xf32, #tpu.memory_space<vmem>>, vector<8x128xf32>,
    %cst_10 = arith.constant 0.899999976 : f32
    %cst_11 = arith.constant 5.05050528E-4 : f32
    %31 = vector.broadcast %cst_10 : f32 to vector<8x128xf32>
    %32 = vector.broadcast %cst_11 : f32 to vector<8x128xf32>
    %33 = arith.select %7, %31, %32 : vector<8x128xi1>, vector<8x128xf32>
    %cst_12 = arith.constant 0.000000e+00 : f32
    %34 = vector.broadcast %cst_12 : f32 to vector<8x128xf32>
    %35 = arith.select %18, %34, %33 : vector<8x128xi1>, vector<8x128xf32>
    %c0_13 = arith.constant 0 : index
    %c0_14 = arith.constant 0 : index
    %36 = vector.load %arg5[%c0_13, %c0_14] : memref<8x128xf32, #tpu.memory_space<vmem>>, vector<8x128xf32>
    tpu.vector_store %arg5[%c0_13, %c0_14], %35 {strides = array<i32>} : memref<8x128xf32, #tpu.memory_space<vmem>>, vector<8x128xf32>,
    return
  }
  func.func @transform_0(%arg0: i32, %arg1: i32) -> (i32, i32) {
    %c0_i32 = arith.constant 0 : i32
    %c0_i32_0 = arith.constant 0 : i32
    return %arg0, %c0_i32 : i32, i32
  }
  func.func @transform_1(%arg0: i32, %arg1: i32) -> (i32, i32) {
    %c0_i32 = arith.constant 0 : i32
    return %arg0, %arg1 : i32, i32
  }
  func.func @transform_2(%arg0: i32, %arg1: i32) -> (i32, i32) {
    %c0_i32 = arith.constant 0 : i32
    return %arg0, %arg1 : i32, i32
  }
  func.func @transform_3(%arg0: i32, %arg1: i32) -> (i32, i32) {
    %c0_i32 = arith.constant 0 : i32
    return %arg0, %arg1 : i32, i32
  }
}

</mosaic_0001>

<bundles_post_ra>
// kernel: tpu_custom_call.1
= control target key start
LH: loop header
LB: loop body
LE: loop exit
PB: predicated region body
PF: predicated region fallthrough
CT: control target
= control target key end

     0   :  { %9 = vsyncpa [#allocation3], 0  ;;  %s912_s0 = inlined_call_operand.vmem [shape: s32[16,1], index: 0, kind: input, shape index: {}]   ;;  %s913_s1 = inlined_call_operand.hbm [shape: f32[13,200], index: 1, kind: input, shape index: {}]   ;;  %s914_s2 = inlined_call_operand.hbm [shape: f32[16,256], index: 2, kind: output, shape index: {0}]   ;;  %s915_s3 = inlined_call_operand.hbm [shape: f32[13,200], index: 3, kind: output, shape index: {1}]  }
   0x1   :  { %11 = vsyncpa [#allocation3 + $0x1], 0 }
   0x2   :  { %12 = vsyncpa [#allocation4], 0 }
   0x3   :  { %14 = vsyncpa [#allocation4 + $0x1], 0 }
   0x4   :  { %15 = vsyncpa [#allocation7], 0 }
   0x5   :  { %17 = vsyncpa [#allocation7 + $0x1], 0  ;;  %s733_s12 = smov 0   ;;  %s735_s13 = smov 0  }
   0x6   :  { %s737_s14 = smov 0   ;;  %s739_s15 = smov 0  }
   0x7   :  { %s741_s16 = smov 0   ;;  %s743_s17 = smov 0  }
   0x8   :  { %s745_s18 = smov 0   ;;  %s747_s19 = smov 0  }
   0x9 LB: > { %s442_s20 = sadd.s32 4294967295, %s709_s19   ;;  %s443_s21 = sadd.s32 4294967294, %s709_s19   ;;  %s709_s19 = sphi %s747_s19, %s23_s19   ;;  %s705_s18 = sphi %s745_s18, %s929_s18   ;;  %s701_s17 = sphi %s743_s17, %s928_s17   ;;  %s697_s16 = sphi %s741_s16, %s927_s16   ;;  %s693_s15 = sphi %s739_s15, %s926_s15   ;;  %s689_s14 = sphi %s737_s14, %s925_s14   ;;  %s685_s13 = sphi %s735_s13, %s924_s13   ;;  %s681_s12 = sphi %s733_s12, %s923_s12  }
   0xa   : > { %s32_s22 = sadd.s32 1, %s701_s17  ;;  %s35_s23 = sadd.s32 1, %s705_s18 }
   0xb   : > { %p33_p0 = scmp.ge.s32.totalorder %s32_s22, 2  ;;  %s70_s24 = sadd.s32 1, %s689_s14 }
   0xc   : > { %p77_p1 = scmp.ne.s32.totalorder %s689_s14, %s685_s13  ;;  %p78_p2 = scmp.eq.s32.totalorder %s709_s19, 0 }
   0xd   : > { %s931_s22 = smov (%p33_p0, %s32_s22), 0  ;;  %s933_s23 = smov (!%p33_p0, %s35_s23), %s705_s18 }
   0xe   : > { %s66_s25 = ssub.s32 %s701_s17, %s931_s22  ;;  %p786_p3 = por %p78_p2, %p77_p1 }
   0xf   : > { %p37_p4 = scmp.ge.s32.totalorder %s933_s23, 2  ;;  %p83_p5 = scmp.ne.s32.totalorder %s685_s13, %s681_s12 }
  0x10   : > { %p84_p6 = scmp.eq.s32.totalorder %s442_s20, 0  ;;  %p109_p7 = scmp.eq.s32.totalorder %s442_s20, 3 }
  0x11   : > { %s935_s23 = smov (%p37_p4, %s933_s23), 0  ;;  %p115_p10 = scmp.eq.s32.totalorder %s443_s21, 3 }
  0x12   : > { %918 = sst [smem:[#allocation11_spill]] %s935_s23  ;;  %p794_p8 = por %p84_p6, %p83_p5 }
  0x13   : > { %p798_p9 = por %p109_p7, %p77_p1  ;;  %s65_s29 = ssub.s32 %s705_s18, %s935_s23 }
  0x14   : > { %s67_s30 = sor.u32 %s66_s25, %s65_s29  ;;  %p804_p12 = por %p115_p10, %p83_p5 }
  0x15   : > { %p68_p11 = scmp.eq.s32.totalorder %s67_s30, 0  ;;  %p480_p13 = scmp.lt.s32.totalorder %s709_s19, 4 }
  0x16   : > { %s170_s5 = sand.u32 1, %s689_s14   ;;  %s447_s8 = sshll.u32 %s705_s18, 1 }
  0x17   : > { %s811_s6 = scalar_select %p68_p11, %s689_s14, %s70_s24  }
  0x18   : > { %s446_s7 = sshll.u32 %s170_s5, 3  ;;  %s178_s9 = sadd.s32 %s701_s17, %s447_s8 }
  0x19   : > { %s174_s10 = scalar_lea.vmem [#allocation2], %s446_s7  ;;  %s448_s20 = sshll.u32 %s178_s9, 3 }
  0x1a   : > { %s184_s11 = sshll.u32 %s174_s10, 4  ;;  %s180_s29 = scalar_lea.hbm %s913_s1, %s448_s20  ;;  %s185_s11 = int_to_ptr.vmem [resolvable:$true] %s184_s11 }
  0x1b   : > { %p470_p0 = pnand %p480_p13, %p786_p3  ;;  %s182_s30 = sshll.u32 %s180_s29, 4  ;;  %s183_s30 = int_to_ptr.hbm [resolvable:$true] %s182_s30 }
  0x1c   : > { %p449_p1 = scmp.ge.s32.totalorder %s709_s19, 1  ;;  %s171_s23 = scalar_lea.sflag [#allocation3], %s170_s5 }
  0x1d   : > { %472 = dma.hbm_to_vmem [thread:$0]  (!%p470_p0), %s183_s30, 128, %s185_s11, %s171_s23  }
  0x1e   : > { %p189_p2 = scmp.lt.s32.totalorder %s709_s19, 5 }
  0x20   : > { %p190_p4 = pnand %p449_p1, %p189_p2 }
  0x21   : > { %s823_s24 = sand.u32 (!%p190_p4), 1, %s685_s13  }
  0x22   : > { %193 = sbr.rel (%p190_p4) target bundleno = 191 (0xbf), region = 28  ;;  %s826_s7 = sshll.u32 (!%p190_p4), %s823_s24, 3 }
  0x23   : > { %s196_s8 = scalar_lea.sflag (!%p190_p4), [#allocation3], %s823_s24  ;;  %s199_s26 = scalar_lea.vmem (!%p190_p4), [#allocation2], %s826_s7 }
  0x27   : > { %668 = dma.done.wait (%p794_p8), %s196_s8, 128  }
  0x28   : > { %670 = vsyncadd (%p794_p8), %s196_s8, 4294967168  ;;  %p232_p3 = scmp.lt.s32.totalorder %s697_s16, 1  ;;  %v711_v0 = vmov 0   ;;  %s454_s20 = sshll.u32 %s693_s15, 7  ;;  %v239_v5 = vlaneseq  ;;  %v237_v6 = vld [vmem:[%s199_s26] sm:$0xff] }
  0x29   : > { %548 = vset.pattern.permute.xlu0 %v711_v0  ;;  %v241_v3 = vstv %s454_s20  ;;  %s457_s27 = sshll.u32 %s697_s16, 1  ;;  %s247_s21 = ssub.s32 0, %s454_s20  ;;  %v261_v10 = vmul.f32 0.9, %v237_v6  ;;  %v263_v11 = vmul.f32 0.0005050505, %v237_v6 }
  0x2a   : > { %s233_s23 = scalar_select %p232_p3, %s697_s16, 1  ;;  %v240_v7 = vand.u32 127, %v239_v5  ;;  %v248_v9 = vstv %s247_s21  ;;  %v712_v17 = vmov 0.0005050505  }
  0x2b   : > { %s287_s25 = sadd.s32 %s693_s15, %s457_s27  ;;  %s257_s29 = ssub.s32 200, %s454_s20  ;;  %v262_v13 = vsub.f32 -0.09482446, %v261_v10  ;;  %v264_v14 = vsub.f32 -0.0038337638, %v263_v11 }
  0x2c   : > { %s453_s5 = sshll.u32 %s233_s23, 3  ;;  %s458_s30 = sshll.u32 %s287_s25, 3  ;;  %vm249_vm1 = vcmp.eq.s32.totalorder %v240_v7, %v248_v9  ;;  %v258_v12 = vstv %s257_s29 }
  0x2d   : > { %s235_s11 = scalar_lea.vmem %s912_s0, %s453_s5  ;;  %s305_s16 = scalar_lea.hbm %s915_s3, %s458_s30  ;;  %vm259_vm3 = vcmp.ge.s32.totalorder %v240_v7, %v258_v12 }
  0x2e   : > { %v238_v1 = vld [vmem:[%s235_s11] sm:$0xff]  ;;  %s289_s15 = scalar_lea.hbm %s914_s2, %s458_s30  ;;  %s231_s26 = scalar_lea.vmem [#allocation6], %s826_s7 }
  0x2f   : > { %vm250_vm0 = vcmp.eq.s32.totalorder %v238_v1, 0  ;;  %v242_v4 = vsub.s32 %v238_v1, %v241_v3  ;;  %s849_s10 = sshll.u32 %s231_s26, 4  ;;  %s309_s11 = sshll.u32 %s305_s16, 4  ;;  %s308_s10 = int_to_ptr.vmem [resolvable:$true] %s849_s10  ;;  %s310_s11 = int_to_ptr.hbm [resolvable:$true] %s309_s11 }
  0x30   : > { %v251_v2 = vsel %vm250_vm0, 1, %v711_v0  ;;  %s224_s20 = scalar_lea.vmem [#allocation5], %s826_s7  ;;  %s293_s21 = sshll.u32 %s289_s15, 4  ;;  %s856_s21 = int_to_ptr.hbm [resolvable:$true] %s293_s21 }
  0x31   : > { %253 = vperm.xlu0 %548, %v251_v2   ;;  %s852_s27 = sshll.u32 %s224_s20, 4  ;;  %s277_s7 = scalar_lea.sflag [#allocation7], %s823_s24  ;;  %s292_s27 = int_to_ptr.vmem [resolvable:$true] %s852_s27 }
  0x32   : > { %s593_s25 = sshra.s32 %s310_s11, 4  ;;  %s599_s23 = scalar_lea.hbm %s915_s3, 32  ;;  %s594_s25 = int_to_ptr.hbm [resolvable:$true] %s593_s25 }
  0x33   : > { %s595_s29 = scalar_lea.hbm %s594_s25, 8  ;;  %p600_p8 = scmp.lt.s32.totalorder %s594_s25, %s915_s3 }
  0x34   : > { %p596_p5 = scmp.ne.s32.totalorder %s594_s25, %s595_s29  ;;  %p601_p10 = scmp.lt.s32.totalorder %s599_s23, %s595_s29 }
  0x36   : > { %p597_p6 = pnand %p596_p5, %p798_p9  ;;  %p602_p11 = por %p601_p10, %p600_p8 }
  0x38   : > { %p598_p7 = pneg %p597_p6 }
  0x39   : > { %244 = vperm.xlu0 %548, %v242_v4  }
  0x3a   : > { %p603_p13 = pnand %p602_p11, %p598_p7 }
  0xa3   : > { %v254_v8 = vpop.permute.xlu0 %253 }
  0xa4   : > { %vm255_vm2 = vcmp.eq.s32.totalorder %v254_v8, 1 }
  0xa5   : > { %vm256_vm4 = vmor %vm249_vm1, %vm255_vm2 }
  0xa6   : > { %vm260_vm6 = vmor %vm256_vm4, %vm259_vm3 }
  0xab   : > { %v245_v15 = vpop.permute.xlu0 %244 }
  0xac   : > { %vm246_vm5 = vcmp.eq.s32.totalorder %v240_v7, %v245_v15 }
  0xad   : > { %v265_v16 = vsel %vm246_vm5, %v262_v13, %v264_v14  ;;  %v268_v18 = vsel %vm246_vm5, 0.9, %v712_v17 }
  0xae   : > { %v266_v19 = vsel %vm260_vm6, 0.0, %v265_v16  ;;  %v269_v20 = vsel %vm260_vm6, 0.0, %v268_v18 }
  0xaf   : > { %270 = vst [vmem:[%s231_s26] sm:$0xff] %v269_v20 }
  0xb0   : > { %267 = vst [vmem:[%s224_s20] sm:$0xff] %v266_v19 }
  0xb1   : > { %606 = shalt.err (!%p603_p13)
}
  0xb2   : > { %466 = dma.vmem_to_hbm [thread:$0]  (%p798_p9), %s308_s10, 128, %s310_s11, %s277_s7  }
  0xb3   : > { %s272_s9 = scalar_lea.sflag [#allocation4], %s823_s24  ;;  %s621_s15 = sshra.s32 %s856_s21, 4  ;;  %s622_s15 = int_to_ptr.hbm [resolvable:$true] %s621_s15 }
  0xb4   : > { %s623_s26 = scalar_lea.hbm %s622_s15, 8  ;;  %s627_s29 = scalar_lea.hbm %s914_s2, 32 }
  0xb5   : > { %p624_p0 = scmp.ne.s32.totalorder %s622_s15, %s623_s26  ;;  %p628_p4 = scmp.lt.s32.totalorder %s622_s15, %s914_s2 }
  0xb6   : > { %p629_p3 = scmp.lt.s32.totalorder %s627_s29, %s623_s26 }
  0xb7   : > { %p625_p1 = pnand %p624_p0, %p798_p9 }
  0xb8   : > { %p630_p5 = por %p629_p3, %p628_p4 }
  0xb9   : > { %p626_p2 = pneg %p625_p1 }
  0xbb   : > { %p631_p6 = pnand %p630_p5, %p626_p2 }
  0xbd   : > { %634 = shalt.err (!%p631_p6)
}
  0xbe   : > { %465 = dma.vmem_to_hbm [thread:$0]  (%p798_p9), %s292_s27, 128, %s856_s21, %s272_s9  }
  0xbf PF: > { %p481_p7 = scmp.ge.s32.totalorder %s709_s19, 2  ;;  %s321_s24 = sand.u32 1, %s681_s12  }
  0xc0   : > { %s322_s10 = scalar_lea.sflag [#allocation4], %s321_s24 }
  0xc1   : > { %p474_p8 = pnand %p481_p7, %p804_p12 }
  0xc3   : > { %p475_p10 = pneg %p474_p8 }
  0xc5   : > { %672 = dma.done.wait (%p475_p10), %s322_s10, 128  }
  0xc6   : > { %674 = vsyncadd (%p475_p10), %s322_s10, 4294967168  ;;  %s332_s11 = scalar_lea.sflag [#allocation7], %s321_s24 }
  0xc7   : > { %676 = dma.done.wait (%p475_p10), %s332_s11, 128  }
  0xc8   : > { %678 = vsyncadd (%p475_p10), %s332_s11, 4294967168  ;;  %s23_s19 = sadd.s32 1, %s709_s19   ;;  %s922_s28 = sld [smem:[#allocation11_spill]] }
  0xc9   : > { %p20_p11 = scmp.ge.s32.totalorder %s23_s19, 6   ;;  %s923_s12 = smov %s685_s13 }
  0xca   : > { %s924_s13 = smov %s689_s14  ;;  %s925_s14 = smov %s811_s6 }
  0xcb   : > { %s926_s15 = smov %s701_s17  ;;  %s927_s16 = smov %s705_s18 }
  0xcc   : > { %s928_s17 = smov %s931_s22  ;;  %22 = sbr.rel (!%p20_p11) target bundleno = 9 (0x9), region = 93 }
  0xce   : > { %s929_s18 = smov %s922_s28 }
  0xd1   :  { %338 = vsyncpa [#allocation3], 1 }
  0xd2   :  { %340 = vsyncpa [#allocation3 + $0x1], 1 }
  0xd3   :  { %341 = vsyncpa [#allocation4], 1 }
  0xd4   :  { %343 = vsyncpa [#allocation4 + $0x1], 1 }
  0xd5   :  { %344 = vsyncpa [#allocation7], 1 }
  0xd6   :  { %346 = vsyncpa [#allocation7 + $0x1], 1 }

</bundles_post_ra>
